<compile_context>
chip_gen: v5e
topology: v5e:2x2
jax: 0.10.0
libtpu: 0.0.40
codegen_flags: <defaults>
</compile_context>

<pallas_src>
import functools
import math

import jax
import jax.numpy as jnp
from jax import lax
from jax.experimental import pallas as pl
from jax.experimental.pallas import tpu as pltpu


def _bert_attention_kernel(hs_ref, ctx_ref, wq_ref, wk_ref, wv_ref,
                           bq_ref, bk_ref, bv_ref, *rest,
                           num_heads, head_dim, mask_mode):
    """Fused QKV projection + multi-head attention for ONE batch element.

    hs_ref : (1, Sq, H)   bf16 hidden_states block
    ctx_ref: (1, Sk, Hc)  bf16 context block
    w*_ref : (H, in)      bf16 Linear weights in PyTorch (out, in) layout
    b*_ref : (1, H)       f32 Linear biases
    mask   : mode 1 -> (1, 1, Sk) additive key mask block
             mode 2 -> (1, NH, Sq, Sk) full additive mask block
    o_ref  : (1, Sq, H)
    """
    if mask_mode == 0:
        (o_ref,) = rest
        mask_ref = None
    else:
        mask_ref, o_ref = rest

    f32 = jnp.float32
    bf16 = jnp.bfloat16
    scale = 1.0 / math.sqrt(head_dim)

    hs = hs_ref[0]        # (Sq, H)   bf16
    ctx = ctx_ref[0]      # (Sk, Hc)  bf16

    # x @ W^T on the MXU: contract dim 1 of the PyTorch-layout weight directly,
    # bf16 inputs, f32 accumulation.
    nt = (((1,), (1,)), ((), ()))
    q = lax.dot_general(hs, wq_ref[...], nt,
                        preferred_element_type=f32) + bq_ref[...]   # (Sq, H) f32
    k = lax.dot_general(ctx, wk_ref[...], nt,
                        preferred_element_type=f32) + bk_ref[...]   # (Sk, H) f32
    v = lax.dot_general(ctx, wv_ref[...], nt,
                        preferred_element_type=f32) + bv_ref[...]   # (Sk, H) f32

    # Fold the 1/sqrt(head_dim) scale into Q once (Sq*H mults, not NH*Sq*Sk).
    qs = (q * scale).astype(bf16)
    kb = k.astype(bf16)
    vb = v.astype(bf16)

    if mask_mode == 1:
        mask_row = mask_ref[0]          # (1, Sk): broadcasts over (Sq, Sk)

    # Heads: batch is on the grid, so this static unroll is only NH iterations.
    outs = []
    for h in range(num_heads):
        lo = h * head_dim
        hi = lo + head_dim
        qh = qs[:, lo:hi]               # (Sq, hd) bf16
        kh = kb[:, lo:hi]               # (Sk, hd) bf16
        vh = vb[:, lo:hi]               # (Sk, hd) bf16

        # Scores (already scaled via Q): (Sq, Sk) f32.
        s = lax.dot_general(qh, kh, nt, preferred_element_type=f32)
        if mask_mode == 1:
            s = s + mask_row
        elif mask_mode == 2:
            s = s + mask_ref[0, h]

        # Numerically-stable softmax over keys; normalization deferred to the
        # (Sq, hd) output and performed with the (free) EUP reciprocal.
        m = jnp.max(s, axis=-1, keepdims=True)
        p = jnp.exp(s - m)                               # f32, values in [0, 1]
        l = jnp.sum(p, axis=-1, keepdims=True)           # (Sq, 1) f32
        # Dropout on attention probs: identity (eval/inference mode).

        o = jnp.dot(p.astype(bf16), vh,
                    preferred_element_type=f32)          # (Sq, hd) f32
        outs.append(o * pl.reciprocal(l, approx=True))

    # Merge heads and do a single lane-dense (Sq, H) store for this batch row.
    o_ref[0] = jnp.concatenate(outs, axis=-1).astype(o_ref.dtype)


def bert_attention_forward(hidden_states, context, wq, bq, wk, bk, wv, bv,
                           num_heads, attention_mask=None):
    """hidden_states: (B, Sq, H); context: (B, Sk, Hc); weights in PyTorch (out,in) layout."""
    B, Sq, H = hidden_states.shape
    _, Sk, Hc = context.shape
    assert H % num_heads == 0
    head_dim = H // num_heads
    f32 = jnp.float32
    bf16 = jnp.bfloat16
    out_dtype = hidden_states.dtype

    # bf16 feeds the MXU natively (accumulation stays f32 inside the kernel);
    # biases stay f32.  Weights are NOT transposed in the wrapper.
    hs_b = hidden_states.astype(bf16)
    ctx_b = context.astype(bf16)
    wq_b = wq.astype(bf16)
    wk_b = wk.astype(bf16)
    wv_b = wv.astype(bf16)
    bq2 = bq.reshape(1, H).astype(f32)
    bk2 = bk.reshape(1, H).astype(f32)
    bv2 = bv.reshape(1, H).astype(f32)

    args = [hs_b, ctx_b, wq_b, wk_b, wv_b, bq2, bk2, bv2]
    in_specs = [
        pl.BlockSpec((1, Sq, H), lambda b: (b, 0, 0)),
        pl.BlockSpec((1, Sk, Hc), lambda b: (b, 0, 0)),
        pl.BlockSpec((H, H), lambda b: (0, 0)),    # resident across the grid
        pl.BlockSpec((H, Hc), lambda b: (0, 0)),
        pl.BlockSpec((H, Hc), lambda b: (0, 0)),
        pl.BlockSpec((1, H), lambda b: (0, 0)),
        pl.BlockSpec((1, H), lambda b: (0, 0)),
        pl.BlockSpec((1, H), lambda b: (0, 0)),
    ]

    mask_mode = 0
    if attention_mask is not None:
        am = jnp.asarray(attention_mask).astype(f32)
        if am.ndim == 4 and am.shape[1] == 1 and am.shape[2] == 1:
            # Canonical BERT additive mask (B,1,1,Sk): pass only (B,1,Sk) and
            # broadcast inside the kernel (no NH*Sq x materialized copy).
            mask_mode = 1
            m = jnp.broadcast_to(am, (B, 1, 1, Sk)).reshape(B, 1, Sk)
            args.append(m)
            in_specs.append(pl.BlockSpec((1, 1, Sk), lambda b: (b, 0, 0)))
        else:
            # General (per-head / per-query) additive mask fallback.
            mask_mode = 2
            m = jnp.broadcast_to(am, (B, num_heads, Sq, Sk)).astype(f32)
            args.append(m)
            in_specs.append(
                pl.BlockSpec((1, num_heads, Sq, Sk), lambda b: (b, 0, 0, 0)))

    kernel = functools.partial(
        _bert_attention_kernel,
        num_heads=num_heads, head_dim=head_dim, mask_mode=mask_mode)

    out = pl.pallas_call(
        kernel,
        out_shape=jax.ShapeDtypeStruct((B, Sq, H), out_dtype),
        grid_spec=pltpu.PrefetchScalarGridSpec(
            num_scalar_prefetch=0,
            grid=(B,),                            # batch on the grid
            in_specs=in_specs,
            out_specs=pl.BlockSpec((1, Sq, H), lambda b: (b, 0, 0)),
        ),
        compiler_params=pltpu.CompilerParams(
            dimension_semantics=("parallel",),    # v7x: shard batch over 2 TCs
            vmem_limit_bytes=48 * 1024 * 1024,
        ),
    )(*args)

    return out


def reference_forward(hidden_states, context, wq, bq, wk, bk, wv, bv,
                      num_heads, attention_mask=None):
    """Pure-JAX f32 reference mirroring the PyTorch forward (eval mode)."""
    hi = lax.Precision.HIGHEST
    B, Sq, H = hidden_states.shape
    _, Sk, _ = context.shape
    hd = H // num_heads

    q = jnp.einsum('bsh,oh->bso', hidden_states, wq, precision=hi) + bq
    k = jnp.einsum('bsh,oh->bso', context, wk, precision=hi) + bk
    v = jnp.einsum('bsh,oh->bso', context, wv, precision=hi) + bv

    def split(x, s):
        return x.reshape(B, s, num_heads, hd).transpose(0, 2, 1, 3)

    qh, kh, vh = split(q, Sq), split(k, Sk), split(v, Sk)
    scores = jnp.einsum('bhqd,bhkd->bhqk', qh, kh, precision=hi) / math.sqrt(hd)
    if attention_mask is not None:
        scores = scores + attention_mask
    probs = jax.nn.softmax(scores, axis=-1)
    out = jnp.einsum('bhqk,bhkd->bhqd', probs, vh, precision=hi)
    return out.transpose(0, 2, 1, 3).reshape(B, Sq, H)


if __name__ == "__main__":
    B, SQ, SK, H, NH = 2, 8, 16, 32, 4

    key = jax.random.PRNGKey(0)
    ks = jax.random.split(key, 9)
    bound = 1.0 / math.sqrt(H)   # PyTorch nn.Linear default init scale

    def uni(k, shape):
        return jax.random.uniform(k, shape, jnp.float32, -bound, bound)

    hidden_states = jax.random.normal(ks[0], (B, SQ, H), jnp.float32)
    context = jax.random.normal(ks[1], (B, SK, H), jnp.float32)
    wq, bq = uni(ks[2], (H, H)), uni(ks[3], (H,))
    wk, bk = uni(ks[4], (H, H)), uni(ks[5], (H,))
    wv, bv = uni(ks[6], (H, H)), uni(ks[7], (H,))
    # Additive attention mask, BERT style (0 = keep, -10000 = drop), shape (B,1,1,Sk).
    attn_mask = jnp.where(jax.random.uniform(ks[8], (B, 1, 1, SK)) < 0.8,
                          0.0, -10000.0).astype(jnp.float32)

    # Tolerance is loosened vs. the HIGHEST-precision f32 reference because the
    # kernel intentionally uses bf16-in / f32-accumulate MXU matmuls.
    TOL = dict(atol=5e-2, rtol=5e-2)

    # 1) default path (attention_mask=None), as in the module's default call.
    out = bert_attention_forward(hidden_states, context, wq, bq, wk, bk, wv, bv, NH)
    out = jax.block_until_ready(out)
    ref = reference_forward(hidden_states, context, wq, bq, wk, bk, wv, bv, NH)
    assert out.shape == (B, SQ, H)
    assert jnp.allclose(out, ref, **TOL), float(jnp.max(jnp.abs(out - ref)))

    # 2) masked cross-attention path.
    out_m = bert_attention_forward(hidden_states, context, wq, bq, wk, bk, wv, bv, NH,
                                   attention_mask=attn_mask)
    out_m = jax.block_until_ready(out_m)
    ref_m = reference_forward(hidden_states, context, wq, bq, wk, bk, wv, bv, NH,
                              attention_mask=attn_mask)
    assert jnp.allclose(out_m, ref_m, **TOL), float(jnp.max(jnp.abs(out_m - ref_m)))

    print("KERNEL_OK")
</pallas_src>

<mosaic_0001>
module attributes {stable_mosaic.version = 11 : i64} {
  func.func @_bert_attention_kernel(%arg0: i32, %arg1: memref<1x8x32xbf16, #tpu.memory_space<vmem>>, %arg2: memref<1x16x32xbf16, #tpu.memory_space<vmem>>, %arg3: memref<32x32xbf16, #tpu.memory_space<vmem>>, %arg4: memref<32x32xbf16, #tpu.memory_space<vmem>>, %arg5: memref<32x32xbf16, #tpu.memory_space<vmem>>, %arg6: memref<1x32xf32, #tpu.memory_space<vmem>>, %arg7: memref<1x32xf32, #tpu.memory_space<vmem>>, %arg8: memref<1x32xf32, #tpu.memory_space<vmem>>, %arg9: memref<1x8x32xf32, #tpu.memory_space<vmem>>) attributes {dimension_semantics = [#tpu.dimension_semantics<parallel>], iteration_bounds = array<i64: 2>, scalar_prefetch = 0 : i64, scratch_operands = 0 : i64, tpu.core_type = #tpu.core_type<tc>, window_params = [{transform_indices = @transform_0, window_bounds = array<i64: 1, 8, 32>}, {transform_indices = @transform_1, window_bounds = array<i64: 1, 16, 32>}, {pipeline_mode = #tpu.pipeline_mode<synchronous>, transform_indices = @transform_2, window_bounds = array<i64: 32, 32>}, {pipeline_mode = #tpu.pipeline_mode<synchronous>, transform_indices = @transform_3, window_bounds = array<i64: 32, 32>}, {pipeline_mode = #tpu.pipeline_mode<synchronous>, transform_indices = @transform_4, window_bounds = array<i64: 32, 32>}, {pipeline_mode = #tpu.pipeline_mode<synchronous>, transform_indices = @transform_5, window_bounds = array<i64: 1, 32>}, {pipeline_mode = #tpu.pipeline_mode<synchronous>, transform_indices = @transform_6, window_bounds = array<i64: 1, 32>}, {pipeline_mode = #tpu.pipeline_mode<synchronous>, transform_indices = @transform_7, window_bounds = array<i64: 1, 32>}, {transform_indices = @transform_8, window_bounds = array<i64: 1, 8, 32>}]} {
    %c0 = arith.constant 0 : index
    %c0_0 = arith.constant 0 : index
    %c0_1 = arith.constant 0 : index
    %0 = vector.load %arg1[%c0, %c0_0, %c0_1] : memref<1x8x32xbf16, #tpu.memory_space<vmem>>, vector<1x8x32xbf16>
    %1 = vector.shape_cast %0 : vector<1x8x32xbf16> to vector<8x32xbf16>
    %c0_2 = arith.constant 0 : index
    %c0_3 = arith.constant 0 : index
    %c0_4 = arith.constant 0 : index
    %2 = vector.load %arg2[%c0_2, %c0_3, %c0_4] : memref<1x16x32xbf16, #tpu.memory_space<vmem>>, vector<1x16x32xbf16>
    %3 = vector.shape_cast %2 : vector<1x16x32xbf16> to vector<16x32xbf16>
    %c0_5 = arith.constant 0 : index
    %c0_6 = arith.constant 0 : index
    %4 = vector.load %arg3[%c0_5, %c0_6] : memref<32x32xbf16, #tpu.memory_space<vmem>>, vector<32x32xbf16>
    %cst = arith.constant dense<0.000000e+00> : vector<8x32xf32>
    %5 = tpu.matmul %1, %4, %cst {dimension_numbers = #tpu.dot_dimension_numbers<[1], [1], [0], [0], [0, 0, 1, 0], [], []>} : vector<8x32xbf16>, vector<32x32xbf16>, vector<8x32xf32> -> vector<8x32xf32>
    %c0_7 = arith.constant 0 : index
    %c0_8 = arith.constant 0 : index
    %6 = vector.load %arg6[%c0_7, %c0_8] : memref<1x32xf32, #tpu.memory_space<vmem>>, vector<1x32xf32>
    %7 = vector.broadcast %6 : vector<1x32xf32> to vector<8x32xf32>
    %8 = arith.addf %5, %7 : vector<8x32xf32>
    %c0_9 = arith.constant 0 : index
    %c0_10 = arith.constant 0 : index
    %9 = vector.load %arg4[%c0_9, %c0_10] : memref<32x32xbf16, #tpu.memory_space<vmem>>, vector<32x32xbf16>
    %cst_11 = arith.constant dense<0.000000e+00> : vector<16x32xf32>
    %10 = tpu.matmul %3, %9, %cst_11 {dimension_numbers = #tpu.dot_dimension_numbers<[1], [1], [0], [0], [0, 0, 1, 0], [], []>} : vector<16x32xbf16>, vector<32x32xbf16>, vector<16x32xf32> -> vector<16x32xf32>
    %c0_12 = arith.constant 0 : index
    %c0_13 = arith.constant 0 : index
    %11 = vector.load %arg7[%c0_12, %c0_13] : memref<1x32xf32, #tpu.memory_space<vmem>>, vector<1x32xf32>
    %12 = vector.broadcast %11 : vector<1x32xf32> to vector<16x32xf32>
    %13 = arith.addf %10, %12 : vector<16x32xf32>
    %c0_14 = arith.constant 0 : index
    %c0_15 = arith.constant 0 : index
    %14 = vector.load %arg5[%c0_14, %c0_15] : memref<32x32xbf16, #tpu.memory_space<vmem>>, vector<32x32xbf16>
    %cst_16 = arith.constant dense<0.000000e+00> : vector<16x32xf32>
    %15 = tpu.matmul %3, %14, %cst_16 {dimension_numbers = #tpu.dot_dimension_numbers<[1], [1], [0], [0], [0, 0, 1, 0], [], []>} : vector<16x32xbf16>, vector<32x32xbf16>, vector<16x32xf32> -> vector<16x32xf32>
    %c0_17 = arith.constant 0 : index
    %c0_18 = arith.constant 0 : index
    %16 = vector.load %arg8[%c0_17, %c0_18] : memref<1x32xf32, #tpu.memory_space<vmem>>, vector<1x32xf32>
    %17 = vector.broadcast %16 : vector<1x32xf32> to vector<16x32xf32>
    %18 = arith.addf %15, %17 : vector<16x32xf32>
    %cst_19 = arith.constant 0.353553385 : f32
    %19 = vector.broadcast %cst_19 : f32 to vector<8x32xf32>
    %20 = arith.mulf %8, %19 : vector<8x32xf32>
    %21 = arith.truncf %20 : vector<8x32xf32> to vector<8x32xbf16>
    %22 = arith.truncf %13 : vector<16x32xf32> to vector<16x32xbf16>
    %23 = arith.truncf %18 : vector<16x32xf32> to vector<16x32xbf16>
    %24 = vector.extract_strided_slice %21 {offsets = [0, 0], sizes = [8, 8], strides = [1, 1]} : vector<8x32xbf16> to vector<8x8xbf16>
    %25 = vector.extract_strided_slice %22 {offsets = [0, 0], sizes = [16, 8], strides = [1, 1]} : vector<16x32xbf16> to vector<16x8xbf16>
    %26 = vector.extract_strided_slice %23 {offsets = [0, 0], sizes = [16, 8], strides = [1, 1]} : vector<16x32xbf16> to vector<16x8xbf16>
    %cst_20 = arith.constant dense<0.000000e+00> : vector<8x16xf32>
    %27 = tpu.matmul %24, %25, %cst_20 {dimension_numbers = #tpu.dot_dimension_numbers<[1], [1], [0], [0], [0, 0, 1, 0], [], []>} : vector<8x8xbf16>, vector<16x8xbf16>, vector<8x16xf32> -> vector<8x16xf32>
    %cst_21 = arith.constant dense<0xFF800000> : vector<8xf32>
    %28 = vector.multi_reduction <maximumf>, %27, %cst_21 [1] : vector<8x16xf32> to vector<8xf32>
    %29 = vector.shape_cast %28 : vector<8xf32> to vector<8x1xf32>
    %30 = vector.broadcast %29 : vector<8x1xf32> to vector<8x16xf32>
    %31 = arith.subf %27, %30 : vector<8x16xf32>
    %32 = math.exp %31 : vector<8x16xf32>
    %cst_22 = arith.constant dense<0.000000e+00> : vector<8xf32>
    %33 = vector.multi_reduction <add>, %32, %cst_22 [1] : vector<8x16xf32> to vector<8xf32>
    %34 = vector.shape_cast %33 : vector<8xf32> to vector<8x1xf32>
    %35 = arith.truncf %32 : vector<8x16xf32> to vector<8x16xbf16>
    %cst_23 = arith.constant dense<0.000000e+00> : vector<8x8xf32>
    %36 = tpu.matmul %35, %26, %cst_23 {dimension_numbers = #tpu.dot_dimension_numbers<[1], [0], [0], [1], [0, 0, 1, 1], [], []>} : vector<8x16xbf16>, vector<16x8xbf16>, vector<8x8xf32> -> vector<8x8xf32>
    %37 = tpu.reciprocal %34 {approx = true} : vector<8x1xf32> -> vector<8x1xf32>
    %38 = vector.broadcast %37 : vector<8x1xf32> to vector<8x8xf32>
    %39 = arith.mulf %36, %38 : vector<8x8xf32>
    %40 = vector.extract_strided_slice %21 {offsets = [0, 8], sizes = [8, 8], strides = [1, 1]} : vector<8x32xbf16> to vector<8x8xbf16>
    %41 = vector.extract_strided_slice %22 {offsets = [0, 8], sizes = [16, 8], strides = [1, 1]} : vector<16x32xbf16> to vector<16x8xbf16>
    %42 = vector.extract_strided_slice %23 {offsets = [0, 8], sizes = [16, 8], strides = [1, 1]} : vector<16x32xbf16> to vector<16x8xbf16>
    %cst_24 = arith.constant dense<0.000000e+00> : vector<8x16xf32>
    %43 = tpu.matmul %40, %41, %cst_24 {dimension_numbers = #tpu.dot_dimension_numbers<[1], [1], [0], [0], [0, 0, 1, 0], [], []>} : vector<8x8xbf16>, vector<16x8xbf16>, vector<8x16xf32> -> vector<8x16xf32>
    %cst_25 = arith.constant dense<0xFF800000> : vector<8xf32>
    %44 = vector.multi_reduction <maximumf>, %43, %cst_25 [1] : vector<8x16xf32> to vector<8xf32>
    %45 = vector.shape_cast %44 : vector<8xf32> to vector<8x1xf32>
    %46 = vector.broadcast %45 : vector<8x1xf32> to vector<8x16xf32>
    %47 = arith.subf %43, %46 : vector<8x16xf32>
    %48 = math.exp %47 : vector<8x16xf32>
    %cst_26 = arith.constant dense<0.000000e+00> : vector<8xf32>
    %49 = vector.multi_reduction <add>, %48, %cst_26 [1] : vector<8x16xf32> to vector<8xf32>
    %50 = vector.shape_cast %49 : vector<8xf32> to vector<8x1xf32>
    %51 = arith.truncf %48 : vector<8x16xf32> to vector<8x16xbf16>
    %cst_27 = arith.constant dense<0.000000e+00> : vector<8x8xf32>
    %52 = tpu.matmul %51, %42, %cst_27 {dimension_numbers = #tpu.dot_dimension_numbers<[1], [0], [0], [1], [0, 0, 1, 1], [], []>} : vector<8x16xbf16>, vector<16x8xbf16>, vector<8x8xf32> -> vector<8x8xf32>
    %53 = tpu.reciprocal %50 {approx = true} : vector<8x1xf32> -> vector<8x1xf32>
    %54 = vector.broadcast %53 : vector<8x1xf32> to vector<8x8xf32>
    %55 = arith.mulf %52, %54 : vector<8x8xf32>
    %56 = vector.extract_strided_slice %21 {offsets = [0, 16], sizes = [8, 8], strides = [1, 1]} : vector<8x32xbf16> to vector<8x8xbf16>
    %57 = vector.extract_strided_slice %22 {offsets = [0, 16], sizes = [16, 8], strides = [1, 1]} : vector<16x32xbf16> to vector<16x8xbf16>
    %58 = vector.extract_strided_slice %23 {offsets = [0, 16], sizes = [16, 8], strides = [1, 1]} : vector<16x32xbf16> to vector<16x8xbf16>
    %cst_28 = arith.constant dense<0.000000e+00> : vector<8x16xf32>
    %59 = tpu.matmul %56, %57, %cst_28 {dimension_numbers = #tpu.dot_dimension_numbers<[1], [1], [0], [0], [0, 0, 1, 0], [], []>} : vector<8x8xbf16>, vector<16x8xbf16>, vector<8x16xf32> -> vector<8x16xf32>
    %cst_29 = arith.constant dense<0xFF800000> : vector<8xf32>
    %60 = vector.multi_reduction <maximumf>, %59, %cst_29 [1] : vector<8x16xf32> to vector<8xf32>
    %61 = vector.shape_cast %60 : vector<8xf32> to vector<8x1xf32>
    %62 = vector.broadcast %61 : vector<8x1xf32> to vector<8x16xf32>
    %63 = arith.subf %59, %62 : vector<8x16xf32>
    %64 = math.exp %63 : vector<8x16xf32>
    %cst_30 = arith.constant dense<0.000000e+00> : vector<8xf32>
    %65 = vector.multi_reduction <add>, %64, %cst_30 [1] : vector<8x16xf32> to vector<8xf32>
    %66 = vector.shape_cast %65 : vector<8xf32> to vector<8x1xf32>
    %67 = arith.truncf %64 : vector<8x16xf32> to vector<8x16xbf16>
    %cst_31 = arith.constant dense<0.000000e+00> : vector<8x8xf32>
    %68 = tpu.matmul %67, %58, %cst_31 {dimension_numbers = #tpu.dot_dimension_numbers<[1], [0], [0], [1], [0, 0, 1, 1], [], []>} : vector<8x16xbf16>, vector<16x8xbf16>, vector<8x8xf32> -> vector<8x8xf32>
    %69 = tpu.reciprocal %66 {approx = true} : vector<8x1xf32> -> vector<8x1xf32>
    %70 = vector.broadcast %69 : vector<8x1xf32> to vector<8x8xf32>
    %71 = arith.mulf %68, %70 : vector<8x8xf32>
    %72 = vector.extract_strided_slice %21 {offsets = [0, 24], sizes = [8, 8], strides = [1, 1]} : vector<8x32xbf16> to vector<8x8xbf16>
    %73 = vector.extract_strided_slice %22 {offsets = [0, 24], sizes = [16, 8], strides = [1, 1]} : vector<16x32xbf16> to vector<16x8xbf16>
    %74 = vector.extract_strided_slice %23 {offsets = [0, 24], sizes = [16, 8], strides = [1, 1]} : vector<16x32xbf16> to vector<16x8xbf16>
    %cst_32 = arith.constant dense<0.000000e+00> : vector<8x16xf32>
    %75 = tpu.matmul %72, %73, %cst_32 {dimension_numbers = #tpu.dot_dimension_numbers<[1], [1], [0], [0], [0, 0, 1, 0], [], []>} : vector<8x8xbf16>, vector<16x8xbf16>, vector<8x16xf32> -> vector<8x16xf32>
    %cst_33 = arith.constant dense<0xFF800000> : vector<8xf32>
    %76 = vector.multi_reduction <maximumf>, %75, %cst_33 [1] : vector<8x16xf32> to vector<8xf32>
    %77 = vector.shape_cast %76 : vector<8xf32> to vector<8x1xf32>
    %78 = vector.broadcast %77 : vector<8x1xf32> to vector<8x16xf32>
    %79 = arith.subf %75, %78 : vector<8x16xf32>
    %80 = math.exp %79 : vector<8x16xf32>
    %cst_34 = arith.constant dense<0.000000e+00> : vector<8xf32>
    %81 = vector.multi_reduction <add>, %80, %cst_34 [1] : vector<8x16xf32> to vector<8xf32>
    %82 = vector.shape_cast %81 : vector<8xf32> to vector<8x1xf32>
    %83 = arith.truncf %80 : vector<8x16xf32> to vector<8x16xbf16>
    %cst_35 = arith.constant dense<0.000000e+00> : vector<8x8xf32>
    %84 = tpu.matmul %83, %74, %cst_35 {dimension_numbers = #tpu.dot_dimension_numbers<[1], [0], [0], [1], [0, 0, 1, 1], [], []>} : vector<8x16xbf16>, vector<16x8xbf16>, vector<8x8xf32> -> vector<8x8xf32>
    %85 = tpu.reciprocal %82 {approx = true} : vector<8x1xf32> -> vector<8x1xf32>
    %86 = vector.broadcast %85 : vector<8x1xf32> to vector<8x8xf32>
    %87 = arith.mulf %84, %86 : vector<8x8xf32>
    %88 = tpu.concatenate %39, %55, %71, %87 in 1 : vector<8x8xf32>, vector<8x8xf32>, vector<8x8xf32>, vector<8x8xf32> -> vector<8x32xf32>
    %c0_36 = arith.constant 0 : index
    %c0_37 = arith.constant 0 : index
    %c0_38 = arith.constant 0 : index
    %89 = vector.load %arg9[%c0_36, %c0_37, %c0_38] : memref<1x8x32xf32, #tpu.memory_space<vmem>>, vector<1x8x32xf32>
    %90 = vector.shape_cast %89 : vector<1x8x32xf32> to vector<8x32xf32>
    %91 = vector.shape_cast %88 : vector<8x32xf32> to vector<1x8x32xf32>
    tpu.vector_store %arg9[%c0_36, %c0_37, %c0_38], %91 {strides = array<i32>} : memref<1x8x32xf32, #tpu.memory_space<vmem>>, vector<1x8x32xf32>,
    return
  }
  func.func @transform_0(%arg0: i32) -> (i32, i32, i32) {
    %c0_i32 = arith.constant 0 : i32
    %c0_i32_0 = arith.constant 0 : i32
    %c0_i32_1 = arith.constant 0 : i32
    return %arg0, %c0_i32, %c0_i32_0 : i32, i32, i32
  }
  func.func @transform_1(%arg0: i32) -> (i32, i32, i32) {
    %c0_i32 = arith.constant 0 : i32
    %c0_i32_0 = arith.constant 0 : i32
    %c0_i32_1 = arith.constant 0 : i32
    return %arg0, %c0_i32, %c0_i32_0 : i32, i32, i32
  }
  func.func @transform_2(%arg0: i32) -> (i32, i32) {
    %c0_i32 = arith.constant 0 : i32
    %c0_i32_0 = arith.constant 0 : i32
    %c0_i32_1 = arith.constant 0 : i32
    return %c0_i32, %c0_i32_0 : i32, i32
  }
  func.func @transform_3(%arg0: i32) -> (i32, i32) {
    %c0_i32 = arith.constant 0 : i32
    %c0_i32_0 = arith.constant 0 : i32
    %c0_i32_1 = arith.constant 0 : i32
    return %c0_i32, %c0_i32_0 : i32, i32
  }
  func.func @transform_4(%arg0: i32) -> (i32, i32) {
    %c0_i32 = arith.constant 0 : i32
    %c0_i32_0 = arith.constant 0 : i32
    %c0_i32_1 = arith.constant 0 : i32
    return %c0_i32, %c0_i32_0 : i32, i32
  }
  func.func @transform_5(%arg0: i32) -> (i32, i32) {
    %c0_i32 = arith.constant 0 : i32
    %c0_i32_0 = arith.constant 0 : i32
    %c0_i32_1 = arith.constant 0 : i32
    return %c0_i32, %c0_i32_0 : i32, i32
  }
  func.func @transform_6(%arg0: i32) -> (i32, i32) {
    %c0_i32 = arith.constant 0 : i32
    %c0_i32_0 = arith.constant 0 : i32
    %c0_i32_1 = arith.constant 0 : i32
    return %c0_i32, %c0_i32_0 : i32, i32
  }
  func.func @transform_7(%arg0: i32) -> (i32, i32) {
    %c0_i32 = arith.constant 0 : i32
    %c0_i32_0 = arith.constant 0 : i32
    %c0_i32_1 = arith.constant 0 : i32
    return %c0_i32, %c0_i32_0 : i32, i32
  }
  func.func @transform_8(%arg0: i32) -> (i32, i32, i32) {
    %c0_i32 = arith.constant 0 : i32
    %c0_i32_0 = arith.constant 0 : i32
    %c0_i32_1 = arith.constant 0 : i32
    return %arg0, %c0_i32, %c0_i32_0 : i32, i32, i32
  }
}

</mosaic_0001>

<bundles_post_ra>
// kernel: tpu_custom_call.1
= control target key start
LH: loop header
LB: loop body
LE: loop exit
PB: predicated region body
PF: predicated region fallthrough
CT: control target
= control target key end

     0   :  { %s1650_s0 = inlined_call_operand.hbm [shape: bf16[2,8,32], index: 0, kind: input, shape index: {}]   ;;  %s1651_s1 = inlined_call_operand.hbm [shape: bf16[2,16,32], index: 1, kind: input, shape index: {}]   ;;  %s1652_s2 = inlined_call_operand.hbm [shape: bf16[32,32], index: 2, kind: input, shape index: {}]   ;;  %s1653_s3 = inlined_call_operand.hbm [shape: bf16[32,32], index: 3, kind: input, shape index: {}]   ;;  %s1654_s4 = inlined_call_operand.hbm [shape: bf16[32,32], index: 4, kind: input, shape index: {}]   ;;  %s1655_s5 = inlined_call_operand.vmem [shape: f32[1,32], index: 5, kind: input, shape index: {}]   ;;  %s1656_s6 = inlined_call_operand.vmem [shape: f32[1,32], index: 6, kind: input, shape index: {}]   ;;  %s1657_s7 = inlined_call_operand.vmem [shape: f32[1,32], index: 7, kind: input, shape index: {}]   ;;  %s1658_s8 = inlined_call_operand.hbm [shape: f32[2,8,32], index: 8, kind: output, shape index: {}]  }
   0x1   :  { %1664 = sst [smem:[#allocation20_spill]] %s1652_s2 }
   0x2   :  { %1665 = sst [smem:[#allocation21_spill]] %s1653_s3 }
   0x3   :  { %1666 = sst [smem:[#allocation22_spill]] %s1654_s4 }
   0x4   :  { %13 = vsyncpa [#allocation3], 0 }
   0x5   :  { %15 = vsyncpa [#allocation3 + $0x1], 0 }
   0x6   :  { %16 = vsyncpa [#allocation6], 0 }
   0x7   :  { %18 = vsyncpa [#allocation6 + $0x1], 0 }
   0x8   :  { %19 = vsyncpa [#allocation9], 0 }
   0x9   :  { %20 = vsyncpa [#allocation4], 0 }
   0xa   :  { %22 = vsyncpa [#allocation4 + $0x1], 0  ;;  %s1392_s27 = smov 0   ;;  %s1394_s28 = smov 0  }
   0xb   :  { %s1396_s29 = smov 0   ;;  %s1398_s30 = smov 0  }
   0xc LB: > { %1667 = sst [smem:[#allocation17_spill]] %s1330_s29  ;;  %s1416_s12 = sadd.s32 4294967295, %s1334_s30   ;;  %s1334_s30 = sphi %s1398_s30, %s1683_s30   ;;  %s1330_s29 = sphi %s1396_s29, %s1685_s29   ;;  %s1326_s28 = sphi %s1394_s28, %s1687_s28   ;;  %s1322_s27 = sphi %s1392_s27, %s1686_s27  }
   0xd   : > { %s1668_s2 = sld [smem:[#allocation20_spill]]  ;;  %p929_p0 = scmp.ge.s32.totalorder %s1334_s30, 1 }
   0xe   : > { %p49_p1 = scmp.eq.s32.totalorder %s1416_s12, 0  ;;  %p237_p2 = scmp.lt.s32.totalorder %s1334_s30, 3 }
   0xf   : > { %s1336_s14 = smov [#allocation7]   ;;  %s1670_s3 = sld [smem:[#allocation21_spill]] }
  0x10   : > { %p1421_p3 = pnand %p929_p0, %p237_p2  ;;  %s250_s15 = sshll.u32 %s1336_s14, 4  ;;  %s251_s15 = int_to_ptr.vmem [resolvable:$true] %s250_s15 }
  0x11   : > { %s1672_s4 = sld [smem:[#allocation22_spill]]  ;;  %s1337_s23 = smov [#allocation8]  }
  0x12   : > { %p1015_p4 = pneg %p1421_p3  ;;  %s264_s24 = sshll.u32 %s1337_s23, 4  ;;  %s265_s24 = int_to_ptr.vmem [resolvable:$true] %s264_s24 }
  0x13   : > { %s248_s11 = sshll.u32 %s1668_s2, 4  ;;  %s1659_s25 = smov 64   ;;  %s249_s11 = int_to_ptr.hbm [resolvable:$true] %s248_s11 }
  0x14   : > { %p1433_p6 = pnand %p1015_p4, %p49_p1  ;;  %s1660_s26 = smov 4  }
  0x15   : > { %s262_s18 = sshll.u32 %s1670_s3, 4  ;;  %s1340_s9 = smov [#allocation10]   ;;  %s263_s18 = int_to_ptr.hbm [resolvable:$true] %s262_s18 }
  0x16   : > { %1018 = dma.hbm_to_vmem [thread:$0]  (!%p1433_p6), %s249_s11, 256, %s251_s15, [#allocation6], %s1659_s25, %s1659_s25, %s1660_s26  }
  0x17   : > { %s276_s22 = sshll.u32 %s1672_s4, 4  ;;  %s278_s10 = sshll.u32 %s1340_s9, 4  ;;  %s277_s22 = int_to_ptr.hbm [resolvable:$true] %s276_s22  ;;  %s279_s10 = int_to_ptr.vmem [resolvable:$true] %s278_s10 }
  0x18   : > { %1021 = dma.hbm_to_vmem [thread:$0]  (!%p1433_p6), %s263_s18, 256, %s265_s24, [#allocation9], %s1659_s25, %s1659_s25, %s1660_s26  }
  0x19   : > { %1024 = dma.hbm_to_vmem [thread:$0]  (!%p1433_p6), %s277_s22, 256, %s279_s10, [#allocation9], %s1659_s25, %s1659_s25, %s1660_s26  }
  0x1a   : > { %s928_s11 = sadd.s32 4294967294, %s1334_s30   ;;  %s1457_s14 = sadd.s32 1, %s1334_s30  }
  0x1b   : > { %1673 = sst [smem:[#allocation18_spill]] %s1457_s14  ;;  %s35_s15 = sadd.s32 1, %s1330_s29 }
  0x1c   : > { %s32_s16 = ssub.s32 %s1334_s30, %s1457_s14  ;;  %p42_p7 = scmp.ne.s32.totalorder %s1330_s29, %s1326_s28 }
  0x1d   : > { %p33_p8 = scmp.eq.s32.totalorder %s32_s16, 0  ;;  %p43_p9 = scmp.eq.s32.totalorder %s1334_s30, 0 }
  0x1e   : > { %p48_p10 = scmp.ne.s32.totalorder %s1326_s28, %s1322_s27  ;;  %p224_p11 = scmp.eq.s32.totalorder %s1416_s12, 1 }
  0x1f   : > { %s1469_s17 = scalar_select %p33_p8, %s1330_s29, %s35_s15  }
  0x20   : > { %p1471_p12 = por %p43_p9, %p42_p7  ;;  %p1477_p13 = por %p49_p1, %p48_p10 }
  0x21   : > { %1674 = sst [smem:[#allocation19_spill]] %s1469_s17  ;;  %p1481_p0 = por %p224_p11, %p42_p7 }
  0x22   : > { %p230_p2 = scmp.eq.s32.totalorder %s928_s11, 1  ;;  %p1039_p4 = scmp.lt.s32.totalorder %s1334_s30, 2 }
  0x23   : > { %s1487_s21 = sand.u32 1, %s1330_s29   ;;  %s935_s24 = sshll.u32 %s1334_s30, 2 }
  0x24   : > { %p1489_p6 = por %p230_p2, %p48_p10  ;;  %s934_s23 = sshll.u32 %s1487_s21, 2 }
  0x25   : > { %s309_s15 = scalar_lea.hbm %s1650_s0, %s935_s24  ;;  %s305_s25 = scalar_lea.vmem [#allocation2], %s934_s23 }
  0x26   : > { %s311_s16 = sshll.u32 %s309_s15, 4  ;;  %s313_s26 = sshll.u32 %s305_s25, 4  ;;  %s312_s16 = int_to_ptr.hbm [resolvable:$true] %s311_s16  ;;  %s314_s26 = int_to_ptr.vmem [resolvable:$true] %s313_s26 }
  0x27   : > { %p1500_p7 = pnand %p1039_p4, %p1471_p12  ;;  %s936_s2 = sshll.u32 %s1487_s21, 3 }
  0x28   : > { %s320_s3 = sand.u32 1, %s1334_s30   ;;  %s324_s4 = scalar_lea.vmem [#allocation5], %s936_s2 }
  0x29   : > { %s332_s17 = sshll.u32 %s324_s4, 4  ;;  %s302_s29 = scalar_lea.sflag [#allocation3], %s1487_s21  ;;  %s333_s17 = int_to_ptr.vmem [resolvable:$true] %s332_s17 }
  0x2a   : > { %s1196_s14 = sshra.s32 %s312_s16, 4  ;;  %p1200_p9 = pneg %p1500_p7  ;;  %s1197_s14 = int_to_ptr.hbm [resolvable:$true] %s1196_s14 }
  0x2b   : > { %s1198_s24 = scalar_lea.hbm %s1197_s14, 4  ;;  %s1203_s23 = scalar_lea.hbm %s1650_s0, 8 }
  0x2c   : > { %p1199_p8 = scmp.ne.s32.totalorder %s1197_s14, %s1198_s24  ;;  %p1204_p12 = scmp.lt.s32.totalorder %s1197_s14, %s1650_s0 }
  0x2d   : > { %p1205_p2 = scmp.lt.s32.totalorder %s1203_s23, %s1198_s24 }
  0x2e   : > { %p1201_p10 = pnand %p1200_p9, %p1199_p8 }
  0x2f   : > { %p1206_p4 = por %p1205_p2, %p1204_p12 }
  0x30   : > { %p1202_p11 = pneg %p1201_p10 }
  0x32   : > { %p1207_p5 = pnand %p1206_p4, %p1202_p11 }
  0x34   : > { %1210 = shalt.err (!%p1207_p5)
}
  0x35   : > { %1028 = dma.hbm_to_vmem [thread:$0]  (!%p1500_p7), %s312_s16, 64, %s314_s26, %s302_s29  }
  0x36   : > { %s989_s2 = sshll.u32 %s1334_s30, 3  ;;  %s321_s18 = scalar_lea.sflag [#allocation6], %s320_s3 }
  0x37   : > { %s329_s15 = scalar_lea.hbm %s1651_s1, %s989_s2  ;;  %s1233_s29 = scalar_lea.hbm %s1651_s1, 16 }
  0x38   : > { %s330_s25 = sshll.u32 %s329_s15, 4  ;;  %s331_s25 = int_to_ptr.hbm [resolvable:$true] %s330_s25 }
  0x39   : > { %s1226_s9 = sshra.s32 %s331_s25, 4  ;;  %s1227_s9 = int_to_ptr.hbm [resolvable:$true] %s1226_s9 }
  0x3a   : > { %s1228_s14 = scalar_lea.hbm %s1227_s9, 8  ;;  %p1234_p11 = scmp.lt.s32.totalorder %s1227_s9, %s1651_s1 }
  0x3b   : > { %p1229_p8 = scmp.ne.s32.totalorder %s1227_s9, %s1228_s14  ;;  %p1235_p12 = scmp.lt.s32.totalorder %s1233_s29, %s1228_s14 }
  0x3d   : > { %p1231_p5 = pnand %p1229_p8, %p1200_p9  ;;  %p1236_p2 = por %p1235_p12, %p1234_p11 }
  0x3f   : > { %p1232_p10 = pneg %p1231_p5 }
  0x41   : > { %p1237_p4 = pnand %p1236_p2, %p1232_p10 }
  0x43   : > { %1240 = shalt.err (!%p1237_p4)
}
  0x44   : > { %s1680_s3 = smov 4   ;;  %s1681_s10 = smov 64  }
  0x45   : > { %1031 = dma.hbm_to_vmem [thread:$0]  (!%p1500_p7), %s331_s25, 128, %s333_s17, %s321_s18, %s1681_s10, %s1681_s10, %s1680_s3  }
  0x46   : > { %344 = sbr.rel (%p1421_p3) target bundleno = 889 (0x379), region = 52  ;;  %s1541_s2 = sand.u32 (!%p1421_p3), 1, %s1326_s28  }
  0x47   : > { %s940_s4 = sshll.u32 (!%p1421_p3), %s1541_s2, 2  ;;  %s347_s21 = scalar_lea.sflag (!%p1421_p3), [#allocation3], %s1541_s2 }
  0x48   : > { %s350_s15 = scalar_lea.vmem (!%p1421_p3), [#allocation2], %s940_s4 }
  0x4b   : > { %1301 = dma.done.wait (%p1477_p13), %s347_s21, 64  }
  0x4c   : > { %1303 = vsyncadd (%p1477_p13), %s347_s21, 4294967232  ;;  %s356_s13 = sand.u32 1, %s1416_s12   ;;  %s941_s17 = sshll.u32 %s1541_s2, 3 }
  0x4d   : > { %s357_s11 = scalar_lea.sflag [#allocation6], %s356_s13  ;;  %s360_s25 = scalar_lea.vmem [#allocation5], %s941_s17 }
  0x4e   : > { %1305 = dma.done.wait (%p1477_p13), %s357_s11, 128  }
  0x4f   : > { %1307 = vsyncadd (%p1477_p13), %s357_s11, 4294967168 }
  0x50   : > { %1309 = dma.done.wait (%p49_p1), [#allocation6], 256  }
  0x51   : > { %1311 = vsyncadd (%p49_p1), [#allocation6], 4294967040 }
  0x52   : > { %1313 = dma.done.wait (%p49_p1), [#allocation9], 512  }
  0x53   : > { %1315 = vsyncadd (%p49_p1), [#allocation9], 4294966784  ;;  %vm436_vm0 = vcmask 261120   ;;  %v994_v0 = vld [vmem:[#allocation8 + $0x8] sm:$0xff]  ;;  %v992_v1 = vld [vmem:[#allocation7 + $0x8] sm:$0xff]  ;;  %s1341_s24 = smov 120  }
  0x54   : > { %v489_v2 = vsel %vm436_vm0, %v994_v0, 0  ;;  %v444_v3 = vsel %vm436_vm0, %v992_v1, 0  ;;  %v993_v4 = vld [vmem:[#allocation8] sm:$0xff]  ;;  %v991_v5 = vld [vmem:[#allocation7] sm:$0xff]  ;;  %v415_v9 = vld [vmem:[%s350_s15] sm:$0xf] }
  0x55   : > { %497 = vmatpush.bf16.xpose.msra.mxu1 %v489_v2  ;;  %452 = vmatpush.bf16.xpose.msra.mxu0 %v444_v3  ;;  %v486_v6 = vsel %vm436_vm0, %v993_v4, 0  ;;  %v441_v7 = vsel %vm436_vm0, %v991_v5, 0  ;;  %v990_v8 = vld [vmem:[%s360_s25] sm:$0xff]  ;;  %v1088_v10 = vld [vmem:[%s1655_s5] ss:$0 sm:$0xff]  ;;  %vm554_vm1 = vcmask 64512  }
  0x56   : > { %v1087_v13 = vld [vmem:[%s1656_s6] ss:$0 sm:$0xff]  ;;  %s1342_s23 = smov 104   ;;  %s1343_s29 = smov 112   ;;  %v995_v31 = vld [vmem:[#allocation10] sm:$0xff]  ;;  %vm574_vm2 = vcmask 130048  }
  0x57   : > { %v996_v29 = vld [vmem:[#allocation10 + $0x8] sm:$0xff]  ;;  %v524_v32 = vsel %vm436_vm0, %v995_v31, 0  ;;  %s1344_s3 = smov 8   ;;  %s1345_s10 = smov 16   ;;  %vm788_vm3 = vcmask 195584  }
  0x58   : > { %v527_v30 = vsel %vm436_vm0, %v996_v29, 0  ;;  %v1089_v45 = vld [vmem:[%s1657_s7] ss:$0 sm:$0xff]  ;;  %s1346_s4 = smov 24   ;;  %s986_s21 = sshll.u32 %s1416_s12, 3 }
  0x59   : > { %535 = vmatpush.bf16.xpose.msra.mxu2 %v527_v30  ;;  %s802_s11 = scalar_lea.hbm %s1658_s8, %s986_s21  ;;  %s413_s25 = scalar_lea.vmem [#allocation11], %s941_s17 }
  0x5a   : > { %s804_s19 = sshll.u32 %s413_s25, 4  ;;  %s806_s18 = sshll.u32 %s802_s11, 4  ;;  %s805_s19 = int_to_ptr.vmem [resolvable:$true] %s804_s19  ;;  %s807_s18 = int_to_ptr.hbm [resolvable:$true] %s806_s18 }
  0x5b   : > { %s792_s12 = scalar_lea.sflag [#allocation4], %s1541_s2  ;;  %s1270_s9 = sshra.s32 %s807_s18, 4  ;;  %s1271_s9 = int_to_ptr.hbm [resolvable:$true] %s1270_s9 }
  0x5c   : > { %s1272_s14 = scalar_lea.hbm %s1271_s9, 8  ;;  %p1277_p7 = scmp.lt.s32.totalorder %s1271_s9, %s1658_s8 }
  0x5d   : > { %498 = vmatpush.bf16.xpose.msra.mxu1 %v486_v6  ;;  %453 = vmatpush.bf16.xpose.msra.mxu0 %v441_v7  ;;  %p1273_p1 = scmp.ne.s32.totalorder %s1271_s9, %s1272_s14 }
  0x5f   : > { %p1274_p3 = pnand %p1273_p1, %p1481_p0 }
  0x61   : > { %536 = vmatpush.bf16.xpose.msra.mxu2 %v524_v32  ;;  %p1275_p13 = pneg %p1274_p3 }
  0x64   : > { %967 = vmatmul.msk.bf16.vlgmr.msra.gmra.mxu1 %vm436_vm0, %v990_v8  ;;  %954 = vmatmul.msk.bf16.vlgmr.msra.gmra.mxu0 %vm436_vm0, %v415_v9 }
  0x68   : > { %976 = vmatmul.msk.bf16.vlgmr.msra.gmra.mxu2 %vm436_vm0, %v990_v8 }
  0xe1   : > { %v500_v11 = vpop.f32.mrf.mxu1  ;;  %v455_v12 = vpop.f32.mrf.mxu0 }
  0xe2   : > { %v456_v14 = vadd.f32 %v1088_v10, %v455_v12  ;;  %v501_v16 = vadd.f32 %v1087_v13, %v500_v11 }
  0xe4   : > { %v543_v15 = vmul.f32 0.35355338, %v456_v14  ;;  %v545_v21 = vpack.c.bf16 %v501_v16, %v501_v16 }
  0xe6   : > { %v544_v17 = vpack.c.bf16 %v543_v15, %v543_v15  ;;  %v551_v25 = vunpack.c.l.b16 %v545_v21 }
  0xe8   : > { %v610_v18 = vunpack.c.l.b16 %v544_v17 }
  0xe9   : > { %v502_v19 = vpop.f32.mrf.mxu1  ;;  %v457_v20 = vpop.f32.mrf.mxu0 }
  0xea   : > { %v503_v22 = vadd.f32 %v1087_v13, %v502_v19  ;;  %v611_v23 = vpack.c.b16 %v610_v18, %v610_v18 }
  0xeb   : > { %v538_v46 = vpop.f32.mrf.mxu2 }
  0xec   : > { %v546_v24 = vpack.c.bf16 %v503_v22, %v503_v22  ;;  %612 = vrot.lane.b32.xlu1 %v611_v23, %s1341_s24  ;;  %v539_v47 = vadd.f32 %v1089_v45, %v538_v46 }
  0xee   : > { %v552_v26 = vunpack.c.l.b16 %v546_v24  ;;  %v547_v48 = vpack.c.bf16 %v539_v47, %v539_v47 }
  0xf0   : > { %v553_v27 = vpack.c.b16 %v552_v26, %v551_v25  ;;  %v587_v51 = vunpack.c.l.b16 %v547_v48 }
  0xf2   : > { %722 = vrot.lane.b32.xlu2 %v553_v27, %s1342_s23  ;;  %614 = vrot.lane.b32.xlu0 %v553_v27, %s1341_s24  ;;  %v559_v28 = vsel %vm554_vm1, %v553_v27, 0 }
  0xf3   : > { %568 = vmatpush.bf16.xpose.msra.mxu3 %v559_v28  ;;  %v540_v49 = vpop.f32.mrf.mxu2 }
  0xf4   : > { %666 = vrot.lane.b32.xlu1 %v611_v23, %s1343_s29  ;;  %v541_v50 = vadd.f32 %v1089_v45, %v540_v49 }
  0xf6   : > { %v548_v52 = vpack.c.bf16 %v541_v50, %v541_v50 }
  0xf8   : > { %v588_v53 = vunpack.c.l.b16 %v548_v52 }
  0xfa   : > { %668 = vrot.lane.b32.xlu0 %v553_v27, %s1343_s29  ;;  %720 = vrot.lane.b32.xlu2 %v611_v23, %s1342_s23  ;;  %v589_v54 = vpack.c.b16 %v588_v53, %v587_v51 }
  0xfb   : > { %977 = vmatmul.msk.bf16.vlgmr.msra.gmra.mxu3 %vm554_vm1, %v544_v17 }
  0xfc   : > { %601 = vmatpush.bf16.msrb.mxu3 %v589_v54 }
 0x14c   : > { %v723_v33 = vpop.permute.xlu2 %722 }
 0x14d   : > { %v728_v36 = vsel %vm554_vm1, %v723_v33, 0 }
 0x154   : > { %v721_v41 = vpop.permute.xlu2 %720 }
 0x15e   : > { %v613_v37 = vpop.permute.xlu1 %612 }
 0x164   : > { %v615_v34 = vpop.permute.xlu0 %614 }
 0x165   : > { %v620_v35 = vsel %vm554_vm1, %v615_v34, 0 }
 0x166   : > { %629 = vmatpush.bf16.xpose.msrb.mxu0 %v620_v35  ;;  %v667_v40 = vpop.permute.xlu1 %666 }
 0x16c   : > { %v669_v38 = vpop.permute.xlu0 %668 }
 0x16d   : > { %979 = vmatmul.msk.bf16.vlgmr.msrb.gmra.mxu0 %vm554_vm1, %v613_v37  ;;  %v674_v39 = vsel %vm554_vm1, %v669_v38, 0 }
 0x16e   : > { %737 = vmatpush.bf16.xpose.msra.mxu0 %v728_v36  ;;  %683 = vmatpush.bf16.xpose.msrb.mxu2 %v674_v39 }
 0x175   : > { %981 = vmatmul.msk.bf16.vlgmr.msrb.gmra.mxu2 %vm554_vm1, %v667_v40 }
 0x17d   : > { %983 = vmatmul.msk.bf16.vlgmr.msra.gmra.mxu0 %vm554_vm1, %v721_v41 }
 0x17e   : > { %v570_v42 = vpop.f32.mrf.mxu3 }
 0x17f   : > { %v575_v43 = vsel %vm574_vm2, %v570_v42, -inf }
 0x180   : > { %576 = vmax.xlane.f32.xlu0 %v575_v43 }
 0x186   : > { %v572_v44 = vpop.f32.mrf.mxu3 }
 0x1ea   : > { %v631_v55 = vpop.f32.mrf.mxu0 }
 0x1eb   : > { %v635_v56 = vsel %vm574_vm2, %v631_v55, -inf }
 0x1ec   : > { %636 = vmax.xlane.f32.xlu1 %v635_v56 }
 0x1f2   : > { %v633_v57 = vpop.f32.mrf.mxu0 }
 0x1f3   : > { %v577_v58 = vpop.xlane.xlu0 %576 }
 0x1f4   : > { %v578_v59 = vsub.f32 %v570_v42, %v577_v58 }
 0x1f6   : > { %v579_v60 = vmul.f32 1.442695, %v578_v59 }
 0x1f8   : > { %1090 = vpow2.f32 %v579_v60  ;;  %v685_v61 = vpop.f32.mrf.mxu2 }
 0x1f9   : > { %v689_v62 = vsel %vm574_vm2, %v685_v61, -inf }
 0x1fa   : > { %v739_v63 = vpop.f32.mrf.mxu0  ;;  %690 = vmax.xlane.f32.xlu2 %v689_v62 }
 0x1fb   : > { %v743_v0 = vsel %vm574_vm2, %v739_v63, -inf }
 0x1fc   : > { %744 = vmax.xlane.f32.xlu0 %v743_v0 }
 0x1fe   : > { %v1091_v1 = vpop.eup %1090 }
 0x1ff   : > { %v584_v2 = vpack.c.bf16 %v1091_v1, %v1091_v1  ;;  %v581_v16 = vsel %vm574_vm2, %v1091_v1, 0.0 }
 0x200   : > { %v687_v3 = vpop.f32.mrf.mxu2 }
 0x201   : > { %978 = vmatmul.msk.bf16.vlgmr.msrb.gmra.mxu3 %vm574_vm2, %v584_v2 }
 0x202   : > { %v741_v4 = vpop.f32.mrf.mxu0 }
 0x205   : > { %699 = vrot.lane.b32.xlu1 %v589_v54, %s1343_s29 }
 0x210   : > { %753 = vrot.lane.b32.xlu0 %v589_v54, %s1342_s23  ;;  %s1276_s23 = scalar_lea.hbm %s1658_s8, 16 }
 0x211   : > { %p1278_p9 = scmp.lt.s32.totalorder %s1276_s23, %s1272_s14 }
 0x212   : > { %645 = vrot.lane.b32.xlu2 %v589_v54, %s1341_s24 }
 0x213   : > { %p1279_p8 = por %p1278_p9, %p1277_p7 }
 0x215   : > { %p1280_p5 = pnand %p1279_p8, %p1275_p13 }
 0x25f   : > { %v637_v5 = vpop.xlane.xlu1 %636 }
 0x260   : > { %v638_v6 = vsub.f32 %v631_v55, %v637_v5 }
 0x262   : > { %v639_v7 = vmul.f32 1.442695, %v638_v6 }
 0x264   : > { %1092 = vpow2.f32 %v639_v7 }
 0x26a   : > { %v1093_v8 = vpop.eup %1092 }
 0x26b   : > { %v641_v9 = vsel %vm574_vm2, %v1093_v8, 0.0  ;;  %v644_v19 = vpack.c.bf16 %v1093_v8, %v1093_v8 }
 0x26c   : > { %642 = vadd.xlane.f32.xlu2 %v641_v9 }
 0x26d   : > { %v691_v10 = vpop.xlane.xlu2 %690 }
 0x26e   : > { %v692_v11 = vsub.f32 %v685_v61, %v691_v10 }
 0x26f   : > { %v745_v12 = vpop.xlane.xlu0 %744 }
 0x270   : > { %v693_v13 = vmul.f32 1.442695, %v692_v11  ;;  %v746_v14 = vsub.f32 %v739_v63, %v745_v12 }
 0x272   : > { %1094 = vpow2.f32 %v693_v13  ;;  %v747_v15 = vmul.f32 1.442695, %v746_v14 }
 0x274   : > { %1096 = vpow2.f32 %v747_v15  ;;  %582 = vadd.xlane.f32.xlu2 %v581_v16 }
 0x275   : > { %v646_v17 = vpop.permute.xlu2 %645 }
 0x276   : > { %658 = vmatpush.bf16.msrb.mxu1 %v646_v17 }
 0x277   : > { %v700_v18 = vpop.permute.xlu1 %699 }
 0x278   : > { %v1095_v20 = vpop.eup %1094  ;;  %712 = vmatpush.bf16.msra.mxu3 %v700_v18 }
 0x279   : > { %v698_v21 = vpack.c.bf16 %v1095_v20, %v1095_v20  ;;  %980 = vmatmul.msk.bf16.vlgmr.msrb.gmra.mxu1 %vm574_vm2, %v644_v19  ;;  %v695_v22 = vsel %vm574_vm2, %v1095_v20, 0.0 }
 0x27a   : > { %v1097_v23 = vpop.eup %1096  ;;  %696 = vadd.xlane.f32.xlu1 %v695_v22 }
 0x27b   : > { %982 = vmatmul.msk.bf16.vlgmr.msra.gmra.mxu3 %vm574_vm2, %v698_v21  ;;  %v749_v24 = vsel %vm574_vm2, %v1097_v23, 0.0  ;;  %v752_v27 = vpack.c.bf16 %v1097_v23, %v1097_v23 }
 0x27c   : > { %750 = vadd.xlane.f32.xlu0 %v749_v24 }
 0x282   : > { %v754_v25 = vpop.permute.xlu0 %753 }
 0x283   : > { %766 = vmatpush.bf16.msra.mxu1 %v754_v25 }
 0x284   : > { %v603_v26 = vpop.f32.mrf.mxu3 }
 0x289   : > { %984 = vmatmul.msk.bf16.vlgmr.msra.gmra.mxu1 %vm574_vm2, %v752_v27 }
 0x28c   : > { %v605_v28 = vpop.f32.mrf.mxu3 }
 0x2df   : > { %v643_v29 = vpop.xlane.xlu2 %642 }
 0x2e0   : > { %1098 = vrcp.f32 %v643_v29 }
 0x2e6   : > { %v1099_v31 = vpop.eup %1098 }
 0x2e7   : > { %v583_v44 = vpop.xlane.xlu2 %582 }
 0x2ed   : > { %v697_v30 = vpop.xlane.xlu1 %696 }
 0x2ee   : > { %1100 = vrcp.f32 %v697_v30 }
 0x2ef   : > { %v751_v34 = vpop.xlane.xlu0 %750 }
 0x2f0   : > { %1102 = vrcp.f32 %v751_v34 }
 0x2f1   : > { %1104 = vrcp.f32 %v583_v44 }
 0x2f4   : > { %v1101_v35 = vpop.eup %1100 }
 0x2f6   : > { %v660_v32 = vpop.f32.mrf.mxu1  ;;  %v1103_v39 = vpop.eup %1102 }
 0x2f7   : > { %v665_v33 = vmul.f32 %v1099_v31, %v660_v32  ;;  %v1105_v45 = vpop.eup %1104 }
 0x2f8   : > { %v608_v47 = vmul.f32 %v1105_v45, %v603_v26 }
 0x2f9   : > { %775 = vrot.lane.b32.xlu1 %v665_v33, %s1344_s3 }
 0x2fe   : > { %v662_v36 = vpop.f32.mrf.mxu1  ;;  %v714_v37 = vpop.f32.mrf.mxu3 }
 0x2ff   : > { %v719_v38 = vmul.f32 %v1101_v35, %v714_v37 }
 0x301   : > { %779 = vrot.lane.b32.xlu0 %v719_v38, %s1345_s10 }
 0x306   : > { %v716_v40 = vpop.f32.mrf.mxu3  ;;  %v768_v41 = vpop.f32.mrf.mxu1 }
 0x307   : > { %v773_v42 = vmul.f32 %v1103_v39, %v768_v41 }
 0x309   : > { %783 = vrot.lane.b32.xlu2 %v773_v42, %s1346_s4 }
 0x30e   : > { %v770_v43 = vpop.f32.mrf.mxu1 }
 0x363   : > { %v784_v50 = vpop.permute.xlu2 %783 }
 0x36b   : > { %v776_v46 = vpop.permute.xlu1 %775 }
 0x36c   : > { %v786_v48 = vsel %vm554_vm1, %v608_v47, %v776_v46 }
 0x373   : > { %v780_v49 = vpop.permute.xlu0 %779 }
 0x374   : > { %v787_v51 = vsel %vm574_vm2, %v786_v48, %v780_v49 }
 0x375   : > { %v789_v52 = vsel %vm788_vm3, %v787_v51, %v784_v50 }
 0x376   : > { %790 = vst.msk [vmem:[%s413_s25] sm:$0xff] %vm436_vm0, %v789_v52 }
 0x377   : > { %1283 = shalt.err (!%p1280_p5)
}
 0x378   : > { %1013 = dma.vmem_to_hbm [thread:$0]  (%p1481_p0), %s805_s19, 128, %s807_s18, %s792_s12  }
 0x379 PF: > { %s818_s2 = sand.u32 1, %s1322_s27   ;;  %p1682_p10 = scmp.ge.s32.totalorder %s1334_s30, 2 }
 0x37a   : > { %s819_s16 = scalar_lea.sflag [#allocation4], %s818_s2 }
 0x37b   : > { %p1033_p11 = pnand %p1682_p10, %p1489_p6 }
 0x37d   : > { %p1034_p12 = pneg %p1033_p11 }
 0x37f   : > { %1317 = dma.done.wait (%p1034_p12), %s819_s16, 128  }
 0x380   : > { %1319 = vsyncadd (%p1034_p12), %s819_s16, 4294967168  ;;  %s1683_s30 = sld [smem:[#allocation18_spill]]  ;;  %s1686_s27 = smov %s1326_s28 }
 0x381   : > { %s1684_s3 = sld [smem:[#allocation17_spill]] }
 0x382   : > { %s1685_s29 = sld [smem:[#allocation19_spill]] }
 0x386   : > { %p25_p2 = scmp.ge.s32.totalorder %s1683_s30, 4  }
 0x387   : > { %s1687_s28 = smov %s1684_s3 }
 0x388   :  { %27 = sbr.rel (!%p25_p2) target bundleno = 12 (0xc), region = 122 }
 0x38d   :  { %825 = vsyncpa [#allocation3], 1 }
 0x38e   :  { %827 = vsyncpa [#allocation3 + $0x1], 1 }
 0x38f   :  { %828 = vsyncpa [#allocation6], 1 }
 0x390   :  { %830 = vsyncpa [#allocation6 + $0x1], 1 }
 0x391   :  { %831 = vsyncpa [#allocation9], 1 }
 0x392   :  { %832 = vsyncpa [#allocation4], 1 }
 0x393   :  { %834 = vsyncpa [#allocation4 + $0x1], 1 }

</bundles_post_ra>
